<compile_context>
chip_gen: v7x
topology: tpu7x:2x2x1
jax: 0.10.0
libtpu: 0.0.40
codegen_flags: <defaults>
</compile_context>

<pallas_src>
import math
import functools

import jax
import jax.numpy as jnp
import numpy as np
from jax.experimental import pallas as pl
from jax.experimental.pallas import tpu as pltpu


# Row/col group membership for the parity decomposition:
#   G(parity=0, tap=0) = {k=0}, G(0,1) = {1,2}, G(1,0) = {0,1}, G(1,1) = {2}
_PARITY_GROUPS = np.array([[[1, 0, 0], [0, 1, 1]],
                           [[1, 1, 0], [0, 0, 1]]], dtype=np.float32)  # [parity, tap, k]


def _fold_weights(w_oihw):
    """(Cout, Cin, 3, 3) conv weight -> (4, 4, Cin, Cout) parity/tap effective weights."""
    C = w_oihw.shape[0]
    R = jnp.asarray(_PARITY_GROUPS)
    # Weff[p, q, a, b, ci, co] = sum_{kh in G(p,a), kw in G(q,b)} w[co, ci, kh, kw]
    w_eff = jnp.einsum('pak,qbl,oikl->pqabio', R, R, w_oihw.astype(jnp.float32))
    return w_eff.reshape(4, 4, C, C)          # [py*2+px, a*2+b, Cin, Cout]


def _upsample_conv_kernel(x_ref, w_ref, b_ref, o_ref):
    """Parity-decomposed upsample+conv on one (batch, row-tile) block.

    x_ref : (1, 1, TH+2, W+2, C)   zero-padded input row slab (channels-last)
    w_ref : (4, 4, C, C)           [parity, tap, Cin, Cout] effective weights
    b_ref : (1, C)                 bias (f32)
    o_ref : (1, 1, 4, TH, W, C)    per-parity conv output at original resolution
    """
    TH = o_ref.shape[3]
    W = o_ref.shape[4]
    bias = b_ref[...].astype(jnp.float32)                       # (1, C)

    def row_body(r, carry):
        # The 3 padded input rows feeding output rows (2r, 2r+1) of this tile.
        rows = (x_ref[0, 0, r], x_ref[0, 0, r + 1], x_ref[0, 0, r + 2])  # each (W+2, C)
        for py in range(2):
            for px in range(2):
                acc = bias                                       # (1, C) -> broadcasts
                for a in range(2):
                    src = rows[py + a]                           # (W+2, C)
                    for bb in range(2):
                        xs = src[px + bb: px + bb + W, :]        # (W, C) static slice
                        acc = acc + jnp.dot(
                            xs, w_ref[2 * py + px, 2 * a + bb],
                            preferred_element_type=jnp.float32)
                o_ref[0, 0, 2 * py + px, r] = acc.astype(o_ref.dtype)
        return carry

    jax.lax.fori_loop(0, TH, row_body, 0)


@functools.partial(jax.jit, static_argnames=("row_tile", "compute_dtype"))
def upsample_forward(x_nchw, w_oihw, bias, temb=None, *, row_tile=8, compute_dtype=None):
    """UpSample.forward semantics (temb is unused, exactly as in the PyTorch module)."""
    B, C, H, W = x_nchw.shape
    H2, W2 = 2 * H, 2 * W
    cdt = jnp.dtype(compute_dtype) if compute_dtype is not None else x_nchw.dtype

    # Row tile that divides H so every block is full-extent (no ragged edge handling).
    TH = min(row_tile, H)
    while H % TH:
        TH -= 1
    nt = H // TH

    # --- glue: everything stays at the original HxW resolution ---
    x = jnp.transpose(x_nchw, (0, 2, 3, 1)).astype(cdt)          # (B, H, W, C) NHWC
    xp = jnp.pad(x, ((0, 0), (1, 1), (1, 1), (0, 0)))            # (B, H+2, W+2, C)
    # Row slabs with a 2-row halo -> non-overlapping blocks for the auto-pipelined DMA.
    slabs = jnp.stack([xp[:, i * TH: i * TH + TH + 2] for i in range(nt)], axis=1)
    # slabs: (B, nt, TH+2, W+2, C)

    w_par = _fold_weights(w_oihw).astype(cdt)                    # (4, 4, C, C)
    b_2d = bias.reshape(1, C).astype(jnp.float32)

    out = pl.pallas_call(
        _upsample_conv_kernel,
        out_shape=jax.ShapeDtypeStruct((B, nt, 4, TH, W, C), x_nchw.dtype),
        grid_spec=pltpu.PrefetchScalarGridSpec(
            num_scalar_prefetch=0,
            grid=(B, nt),
            in_specs=[
                pl.BlockSpec((1, 1, TH + 2, W + 2, C), lambda b, t: (b, t, 0, 0, 0)),
                pl.BlockSpec((4, 4, C, C), lambda b, t: (0, 0, 0, 0)),
                pl.BlockSpec((1, C), lambda b, t: (0, 0)),
            ],
            out_specs=pl.BlockSpec((1, 1, 4, TH, W, C),
                                   lambda b, t: (b, t, 0, 0, 0, 0)),
        ),
        compiler_params=pltpu.CompilerParams(
            dimension_semantics=("parallel", "parallel")),
    )(slabs, w_par, b_2d)

    # Pixel-shuffle the 4 parities back to NCHW (B, C, 2H, 2W).
    out = out.reshape(B, nt, 2, 2, TH, W, C)                     # (b, tile, py, px, r, c, co)
    out = jnp.transpose(out, (0, 6, 1, 4, 2, 5, 3))              # (b, co, tile, r, py, c, px)
    return out.reshape(B, C, H2, W2)


if __name__ == "__main__":
    key = jax.random.PRNGKey(0)
    kx, kw = jax.random.split(key)

    B, C, H, W = 2, 4, 16, 16
    x = jax.random.normal(kx, (B, C, H, W), dtype=jnp.float32)

    # Deterministic parameter init matching the module's initialize():
    #   xavier_uniform_ on Conv2d(C, C, 3): fan_in = fan_out = C*3*3; zeros_ bias.
    bound = math.sqrt(6.0 / (C * 9 + C * 9))
    w = jax.random.uniform(kw, (C, C, 3, 3), minval=-bound, maxval=bound,
                           dtype=jnp.float32)                    # (Cout, Cin, kh, kw)
    b = jnp.zeros((C,), jnp.float32)

    y = jax.block_until_ready(upsample_forward(x, w, b, temb=None))
    assert y.shape == (B, C, 2 * H, 2 * W), y.shape

    # Independent reference: XLA nearest-upsample + conv.
    x_up = jnp.repeat(jnp.repeat(x, 2, axis=2), 2, axis=3)
    ref = jax.lax.conv_general_dilated(
        x_up, w, window_strides=(1, 1), padding=((1, 1), (1, 1)),
        dimension_numbers=("NCHW", "OIHW", "NCHW")) + b.reshape(1, C, 1, 1)
    np.testing.assert_allclose(np.asarray(y), np.asarray(ref), rtol=1e-4, atol=1e-4)

    # bf16 operand path (the memory-bound production configuration); f32 accumulation.
    y_bf16 = jax.block_until_ready(
        upsample_forward(x, w, b, temb=None, compute_dtype=jnp.bfloat16))
    np.testing.assert_allclose(np.asarray(y_bf16), np.asarray(ref), rtol=5e-2, atol=5e-2)

    print("KERNEL_OK")
</pallas_src>

<mosaic_0001>
module attributes {stable_mosaic.version = 11 : i64} {
  func.func @_upsample_conv_kernel(%arg0: i32, %arg1: i32, %arg2: memref<1x1x10x18x4xf32, #tpu.memory_space<vmem>>, %arg3: memref<4x4x4x4xf32, #tpu.memory_space<vmem>>, %arg4: memref<1x4xf32, #tpu.memory_space<vmem>>, %arg5: memref<1x1x4x8x16x4xf32, #tpu.memory_space<vmem>>) attributes {dimension_semantics = [#tpu.dimension_semantics<parallel>, #tpu.dimension_semantics<parallel>], iteration_bounds = array<i64: 2, 2>, scalar_prefetch = 0 : i64, scratch_operands = 0 : i64, tpu.core_type = #tpu.core_type<tc>, window_params = [{transform_indices = @transform_0, window_bounds = array<i64: 1, 1, 10, 18, 4>}, {pipeline_mode = #tpu.pipeline_mode<synchronous>, transform_indices = @transform_1, window_bounds = array<i64: 4, 4, 4, 4>}, {pipeline_mode = #tpu.pipeline_mode<synchronous>, transform_indices = @transform_2, window_bounds = array<i64: 1, 4>}, {transform_indices = @transform_3, window_bounds = array<i64: 1, 1, 4, 8, 16, 4>}]} {
    %c0 = arith.constant 0 : index
    %c0_0 = arith.constant 0 : index
    %0 = vector.load %arg4[%c0, %c0_0] : memref<1x4xf32, #tpu.memory_space<vmem>>, vector<1x4xf32>
    %c0_i32 = arith.constant 0 : i32
    %c8_i32 = arith.constant 8 : i32
    %1 = arith.addi %c0_i32, %c8_i32 : i32
    %c1_i32 = arith.constant 1 : i32
    scf.for %arg6 = %c0_i32 to %1 step %c1_i32  : i32 {
      %c0_2 = arith.constant 0 : index
      %c0_3 = arith.constant 0 : index
      %2 = arith.index_cast %arg6 : i32 to index
      %c0_4 = arith.constant 0 : index
      %c0_5 = arith.constant 0 : index
      %3 = vector.load %arg2[%c0_2, %c0_3, %2, %c0_4, %c0_5] : memref<1x1x10x18x4xf32, #tpu.memory_space<vmem>>, vector<1x1x1x18x4xf32>
      %4 = vector.shape_cast %3 : vector<1x1x1x18x4xf32> to vector<18x4xf32>
      %c1_i32_6 = arith.constant 1 : i32
      %5 = arith.addi %arg6, %c1_i32_6 : i32
      %c0_7 = arith.constant 0 : index
      %c0_8 = arith.constant 0 : index
      %6 = arith.index_cast %5 : i32 to index
      %c0_9 = arith.constant 0 : index
      %c0_10 = arith.constant 0 : index
      %7 = vector.load %arg2[%c0_7, %c0_8, %6, %c0_9, %c0_10] : memref<1x1x10x18x4xf32, #tpu.memory_space<vmem>>, vector<1x1x1x18x4xf32>
      %8 = vector.shape_cast %7 : vector<1x1x1x18x4xf32> to vector<18x4xf32>
      %c2_i32 = arith.constant 2 : i32
      %9 = arith.addi %arg6, %c2_i32 : i32
      %c0_11 = arith.constant 0 : index
      %c0_12 = arith.constant 0 : index
      %10 = arith.index_cast %9 : i32 to index
      %c0_13 = arith.constant 0 : index
      %c0_14 = arith.constant 0 : index
      %11 = vector.load %arg2[%c0_11, %c0_12, %10, %c0_13, %c0_14] : memref<1x1x10x18x4xf32, #tpu.memory_space<vmem>>, vector<1x1x1x18x4xf32>
      %12 = vector.shape_cast %11 : vector<1x1x1x18x4xf32> to vector<18x4xf32>
      %13 = vector.extract_strided_slice %4 {offsets = [0, 0], sizes = [16, 4], strides = [1, 1]} : vector<18x4xf32> to vector<16x4xf32>
      %c0_15 = arith.constant 0 : index
      %c0_16 = arith.constant 0 : index
      %c0_17 = arith.constant 0 : index
      %c0_18 = arith.constant 0 : index
      %14 = vector.load %arg3[%c0_15, %c0_16, %c0_17, %c0_18] : memref<4x4x4x4xf32, #tpu.memory_space<vmem>>, vector<1x1x4x4xf32>
      %15 = vector.shape_cast %14 : vector<1x1x4x4xf32> to vector<4x4xf32>
      %cst = arith.constant dense<0.000000e+00> : vector<16x4xf32>
      %16 = tpu.matmul %13, %15, %cst {dimension_numbers = #tpu.dot_dimension_numbers<[1], [0], [0], [1], [0, 0, 1, 1], [], []>} : vector<16x4xf32>, vector<4x4xf32>, vector<16x4xf32> -> vector<16x4xf32>
      %17 = vector.broadcast %0 : vector<1x4xf32> to vector<16x4xf32>
      %18 = arith.addf %17, %16 : vector<16x4xf32>
      %19 = vector.extract_strided_slice %4 {offsets = [1, 0], sizes = [16, 4], strides = [1, 1]} : vector<18x4xf32> to vector<16x4xf32>
      %c0_19 = arith.constant 0 : index
      %c1 = arith.constant 1 : index
      %c0_20 = arith.constant 0 : index
      %c0_21 = arith.constant 0 : index
      %20 = vector.load %arg3[%c0_19, %c1, %c0_20, %c0_21] : memref<4x4x4x4xf32, #tpu.memory_space<vmem>>, vector<1x1x4x4xf32>
      %21 = vector.shape_cast %20 : vector<1x1x4x4xf32> to vector<4x4xf32>
      %cst_22 = arith.constant dense<0.000000e+00> : vector<16x4xf32>
      %22 = tpu.matmul %19, %21, %cst_22 {dimension_numbers = #tpu.dot_dimension_numbers<[1], [0], [0], [1], [0, 0, 1, 1], [], []>} : vector<16x4xf32>, vector<4x4xf32>, vector<16x4xf32> -> vector<16x4xf32>
      %23 = arith.addf %18, %22 : vector<16x4xf32>
      %24 = vector.extract_strided_slice %8 {offsets = [0, 0], sizes = [16, 4], strides = [1, 1]} : vector<18x4xf32> to vector<16x4xf32>
      %c0_23 = arith.constant 0 : index
      %c2 = arith.constant 2 : index
      %c0_24 = arith.constant 0 : index
      %c0_25 = arith.constant 0 : index
      %25 = vector.load %arg3[%c0_23, %c2, %c0_24, %c0_25] : memref<4x4x4x4xf32, #tpu.memory_space<vmem>>, vector<1x1x4x4xf32>
      %26 = vector.shape_cast %25 : vector<1x1x4x4xf32> to vector<4x4xf32>
      %cst_26 = arith.constant dense<0.000000e+00> : vector<16x4xf32>
      %27 = tpu.matmul %24, %26, %cst_26 {dimension_numbers = #tpu.dot_dimension_numbers<[1], [0], [0], [1], [0, 0, 1, 1], [], []>} : vector<16x4xf32>, vector<4x4xf32>, vector<16x4xf32> -> vector<16x4xf32>
      %28 = arith.addf %23, %27 : vector<16x4xf32>
      %29 = vector.extract_strided_slice %8 {offsets = [1, 0], sizes = [16, 4], strides = [1, 1]} : vector<18x4xf32> to vector<16x4xf32>
      %c0_27 = arith.constant 0 : index
      %c3 = arith.constant 3 : index
      %c0_28 = arith.constant 0 : index
      %c0_29 = arith.constant 0 : index
      %30 = vector.load %arg3[%c0_27, %c3, %c0_28, %c0_29] : memref<4x4x4x4xf32, #tpu.memory_space<vmem>>, vector<1x1x4x4xf32>
      %31 = vector.shape_cast %30 : vector<1x1x4x4xf32> to vector<4x4xf32>
      %cst_30 = arith.constant dense<0.000000e+00> : vector<16x4xf32>
      %32 = tpu.matmul %29, %31, %cst_30 {dimension_numbers = #tpu.dot_dimension_numbers<[1], [0], [0], [1], [0, 0, 1, 1], [], []>} : vector<16x4xf32>, vector<4x4xf32>, vector<16x4xf32> -> vector<16x4xf32>
      %33 = arith.addf %28, %32 : vector<16x4xf32>
      %c0_31 = arith.constant 0 : index
      %c0_32 = arith.constant 0 : index
      %c0_33 = arith.constant 0 : index
      %34 = arith.index_cast %arg6 : i32 to index
      %c0_34 = arith.constant 0 : index
      %c0_35 = arith.constant 0 : index
      %35 = vector.load %arg5[%c0_31, %c0_32, %c0_33, %34, %c0_34, %c0_35] : memref<1x1x4x8x16x4xf32, #tpu.memory_space<vmem>>, vector<1x1x1x1x16x4xf32>
      %36 = vector.shape_cast %35 : vector<1x1x1x1x16x4xf32> to vector<16x4xf32>
      %37 = vector.shape_cast %33 : vector<16x4xf32> to vector<1x1x1x1x16x4xf32>
      tpu.vector_store %arg5[%c0_31, %c0_32, %c0_33, %34, %c0_34, %c0_35], %37 {strides = array<i32>} : memref<1x1x4x8x16x4xf32, #tpu.memory_space<vmem>>, vector<1x1x1x1x16x4xf32>,
      %38 = vector.extract_strided_slice %4 {offsets = [1, 0], sizes = [16, 4], strides = [1, 1]} : vector<18x4xf32> to vector<16x4xf32>
      %c1_36 = arith.constant 1 : index
      %c0_37 = arith.constant 0 : index
      %c0_38 = arith.constant 0 : index
      %c0_39 = arith.constant 0 : index
      %39 = vector.load %arg3[%c1_36, %c0_37, %c0_38, %c0_39] : memref<4x4x4x4xf32, #tpu.memory_space<vmem>>, vector<1x1x4x4xf32>
      %40 = vector.shape_cast %39 : vector<1x1x4x4xf32> to vector<4x4xf32>
      %cst_40 = arith.constant dense<0.000000e+00> : vector<16x4xf32>
      %41 = tpu.matmul %38, %40, %cst_40 {dimension_numbers = #tpu.dot_dimension_numbers<[1], [0], [0], [1], [0, 0, 1, 1], [], []>} : vector<16x4xf32>, vector<4x4xf32>, vector<16x4xf32> -> vector<16x4xf32>
      %42 = vector.broadcast %0 : vector<1x4xf32> to vector<16x4xf32>
      %43 = arith.addf %42, %41 : vector<16x4xf32>
      %44 = vector.extract_strided_slice %4 {offsets = [2, 0], sizes = [16, 4], strides = [1, 1]} : vector<18x4xf32> to vector<16x4xf32>
      %c1_41 = arith.constant 1 : index
      %c1_42 = arith.constant 1 : index
      %c0_43 = arith.constant 0 : index
      %c0_44 = arith.constant 0 : index
      %45 = vector.load %arg3[%c1_41, %c1_42, %c0_43, %c0_44] : memref<4x4x4x4xf32, #tpu.memory_space<vmem>>, vector<1x1x4x4xf32>
      %46 = vector.shape_cast %45 : vector<1x1x4x4xf32> to vector<4x4xf32>
      %cst_45 = arith.constant dense<0.000000e+00> : vector<16x4xf32>
      %47 = tpu.matmul %44, %46, %cst_45 {dimension_numbers = #tpu.dot_dimension_numbers<[1], [0], [0], [1], [0, 0, 1, 1], [], []>} : vector<16x4xf32>, vector<4x4xf32>, vector<16x4xf32> -> vector<16x4xf32>
      %48 = arith.addf %43, %47 : vector<16x4xf32>
      %49 = vector.extract_strided_slice %8 {offsets = [1, 0], sizes = [16, 4], strides = [1, 1]} : vector<18x4xf32> to vector<16x4xf32>
      %c1_46 = arith.constant 1 : index
      %c2_47 = arith.constant 2 : index
      %c0_48 = arith.constant 0 : index
      %c0_49 = arith.constant 0 : index
      %50 = vector.load %arg3[%c1_46, %c2_47, %c0_48, %c0_49] : memref<4x4x4x4xf32, #tpu.memory_space<vmem>>, vector<1x1x4x4xf32>
      %51 = vector.shape_cast %50 : vector<1x1x4x4xf32> to vector<4x4xf32>
      %cst_50 = arith.constant dense<0.000000e+00> : vector<16x4xf32>
      %52 = tpu.matmul %49, %51, %cst_50 {dimension_numbers = #tpu.dot_dimension_numbers<[1], [0], [0], [1], [0, 0, 1, 1], [], []>} : vector<16x4xf32>, vector<4x4xf32>, vector<16x4xf32> -> vector<16x4xf32>
      %53 = arith.addf %48, %52 : vector<16x4xf32>
      %54 = vector.extract_strided_slice %8 {offsets = [2, 0], sizes = [16, 4], strides = [1, 1]} : vector<18x4xf32> to vector<16x4xf32>
      %c1_51 = arith.constant 1 : index
      %c3_52 = arith.constant 3 : index
      %c0_53 = arith.constant 0 : index
      %c0_54 = arith.constant 0 : index
      %55 = vector.load %arg3[%c1_51, %c3_52, %c0_53, %c0_54] : memref<4x4x4x4xf32, #tpu.memory_space<vmem>>, vector<1x1x4x4xf32>
      %56 = vector.shape_cast %55 : vector<1x1x4x4xf32> to vector<4x4xf32>
      %cst_55 = arith.constant dense<0.000000e+00> : vector<16x4xf32>
      %57 = tpu.matmul %54, %56, %cst_55 {dimension_numbers = #tpu.dot_dimension_numbers<[1], [0], [0], [1], [0, 0, 1, 1], [], []>} : vector<16x4xf32>, vector<4x4xf32>, vector<16x4xf32> -> vector<16x4xf32>
      %58 = arith.addf %53, %57 : vector<16x4xf32>
      %c0_56 = arith.constant 0 : index
      %c0_57 = arith.constant 0 : index
      %c1_58 = arith.constant 1 : index
      %59 = arith.index_cast %arg6 : i32 to index
      %c0_59 = arith.constant 0 : index
      %c0_60 = arith.constant 0 : index
      %60 = vector.load %arg5[%c0_56, %c0_57, %c1_58, %59, %c0_59, %c0_60] : memref<1x1x4x8x16x4xf32, #tpu.memory_space<vmem>>, vector<1x1x1x1x16x4xf32>
      %61 = vector.shape_cast %60 : vector<1x1x1x1x16x4xf32> to vector<16x4xf32>
      %62 = vector.shape_cast %58 : vector<16x4xf32> to vector<1x1x1x1x16x4xf32>
      tpu.vector_store %arg5[%c0_56, %c0_57, %c1_58, %59, %c0_59, %c0_60], %62 {strides = array<i32>} : memref<1x1x4x8x16x4xf32, #tpu.memory_space<vmem>>, vector<1x1x1x1x16x4xf32>,
      %63 = vector.extract_strided_slice %8 {offsets = [0, 0], sizes = [16, 4], strides = [1, 1]} : vector<18x4xf32> to vector<16x4xf32>
      %c2_61 = arith.constant 2 : index
      %c0_62 = arith.constant 0 : index
      %c0_63 = arith.constant 0 : index
      %c0_64 = arith.constant 0 : index
      %64 = vector.load %arg3[%c2_61, %c0_62, %c0_63, %c0_64] : memref<4x4x4x4xf32, #tpu.memory_space<vmem>>, vector<1x1x4x4xf32>
      %65 = vector.shape_cast %64 : vector<1x1x4x4xf32> to vector<4x4xf32>
      %cst_65 = arith.constant dense<0.000000e+00> : vector<16x4xf32>
      %66 = tpu.matmul %63, %65, %cst_65 {dimension_numbers = #tpu.dot_dimension_numbers<[1], [0], [0], [1], [0, 0, 1, 1], [], []>} : vector<16x4xf32>, vector<4x4xf32>, vector<16x4xf32> -> vector<16x4xf32>
      %67 = vector.broadcast %0 : vector<1x4xf32> to vector<16x4xf32>
      %68 = arith.addf %67, %66 : vector<16x4xf32>
      %69 = vector.extract_strided_slice %8 {offsets = [1, 0], sizes = [16, 4], strides = [1, 1]} : vector<18x4xf32> to vector<16x4xf32>
      %c2_66 = arith.constant 2 : index
      %c1_67 = arith.constant 1 : index
      %c0_68 = arith.constant 0 : index
      %c0_69 = arith.constant 0 : index
      %70 = vector.load %arg3[%c2_66, %c1_67, %c0_68, %c0_69] : memref<4x4x4x4xf32, #tpu.memory_space<vmem>>, vector<1x1x4x4xf32>
      %71 = vector.shape_cast %70 : vector<1x1x4x4xf32> to vector<4x4xf32>
      %cst_70 = arith.constant dense<0.000000e+00> : vector<16x4xf32>
      %72 = tpu.matmul %69, %71, %cst_70 {dimension_numbers = #tpu.dot_dimension_numbers<[1], [0], [0], [1], [0, 0, 1, 1], [], []>} : vector<16x4xf32>, vector<4x4xf32>, vector<16x4xf32> -> vector<16x4xf32>
      %73 = arith.addf %68, %72 : vector<16x4xf32>
      %74 = vector.extract_strided_slice %12 {offsets = [0, 0], sizes = [16, 4], strides = [1, 1]} : vector<18x4xf32> to vector<16x4xf32>
      %c2_71 = arith.constant 2 : index
      %c2_72 = arith.constant 2 : index
      %c0_73 = arith.constant 0 : index
      %c0_74 = arith.constant 0 : index
      %75 = vector.load %arg3[%c2_71, %c2_72, %c0_73, %c0_74] : memref<4x4x4x4xf32, #tpu.memory_space<vmem>>, vector<1x1x4x4xf32>
      %76 = vector.shape_cast %75 : vector<1x1x4x4xf32> to vector<4x4xf32>
      %cst_75 = arith.constant dense<0.000000e+00> : vector<16x4xf32>
      %77 = tpu.matmul %74, %76, %cst_75 {dimension_numbers = #tpu.dot_dimension_numbers<[1], [0], [0], [1], [0, 0, 1, 1], [], []>} : vector<16x4xf32>, vector<4x4xf32>, vector<16x4xf32> -> vector<16x4xf32>
      %78 = arith.addf %73, %77 : vector<16x4xf32>
      %79 = vector.extract_strided_slice %12 {offsets = [1, 0], sizes = [16, 4], strides = [1, 1]} : vector<18x4xf32> to vector<16x4xf32>
      %c2_76 = arith.constant 2 : index
      %c3_77 = arith.constant 3 : index
      %c0_78 = arith.constant 0 : index
      %c0_79 = arith.constant 0 : index
      %80 = vector.load %arg3[%c2_76, %c3_77, %c0_78, %c0_79] : memref<4x4x4x4xf32, #tpu.memory_space<vmem>>, vector<1x1x4x4xf32>
      %81 = vector.shape_cast %80 : vector<1x1x4x4xf32> to vector<4x4xf32>
      %cst_80 = arith.constant dense<0.000000e+00> : vector<16x4xf32>
      %82 = tpu.matmul %79, %81, %cst_80 {dimension_numbers = #tpu.dot_dimension_numbers<[1], [0], [0], [1], [0, 0, 1, 1], [], []>} : vector<16x4xf32>, vector<4x4xf32>, vector<16x4xf32> -> vector<16x4xf32>
      %83 = arith.addf %78, %82 : vector<16x4xf32>
      %c0_81 = arith.constant 0 : index
      %c0_82 = arith.constant 0 : index
      %c2_83 = arith.constant 2 : index
      %84 = arith.index_cast %arg6 : i32 to index
      %c0_84 = arith.constant 0 : index
      %c0_85 = arith.constant 0 : index
      %85 = vector.load %arg5[%c0_81, %c0_82, %c2_83, %84, %c0_84, %c0_85] : memref<1x1x4x8x16x4xf32, #tpu.memory_space<vmem>>, vector<1x1x1x1x16x4xf32>
      %86 = vector.shape_cast %85 : vector<1x1x1x1x16x4xf32> to vector<16x4xf32>
      %87 = vector.shape_cast %83 : vector<16x4xf32> to vector<1x1x1x1x16x4xf32>
      tpu.vector_store %arg5[%c0_81, %c0_82, %c2_83, %84, %c0_84, %c0_85], %87 {strides = array<i32>} : memref<1x1x4x8x16x4xf32, #tpu.memory_space<vmem>>, vector<1x1x1x1x16x4xf32>,
      %88 = vector.extract_strided_slice %8 {offsets = [1, 0], sizes = [16, 4], strides = [1, 1]} : vector<18x4xf32> to vector<16x4xf32>
      %c3_86 = arith.constant 3 : index
      %c0_87 = arith.constant 0 : index
      %c0_88 = arith.constant 0 : index
      %c0_89 = arith.constant 0 : index
      %89 = vector.load %arg3[%c3_86, %c0_87, %c0_88, %c0_89] : memref<4x4x4x4xf32, #tpu.memory_space<vmem>>, vector<1x1x4x4xf32>
      %90 = vector.shape_cast %89 : vector<1x1x4x4xf32> to vector<4x4xf32>
      %cst_90 = arith.constant dense<0.000000e+00> : vector<16x4xf32>
      %91 = tpu.matmul %88, %90, %cst_90 {dimension_numbers = #tpu.dot_dimension_numbers<[1], [0], [0], [1], [0, 0, 1, 1], [], []>} : vector<16x4xf32>, vector<4x4xf32>, vector<16x4xf32> -> vector<16x4xf32>
      %92 = vector.broadcast %0 : vector<1x4xf32> to vector<16x4xf32>
      %93 = arith.addf %92, %91 : vector<16x4xf32>
      %94 = vector.extract_strided_slice %8 {offsets = [2, 0], sizes = [16, 4], strides = [1, 1]} : vector<18x4xf32> to vector<16x4xf32>
      %c3_91 = arith.constant 3 : index
      %c1_92 = arith.constant 1 : index
      %c0_93 = arith.constant 0 : index
      %c0_94 = arith.constant 0 : index
      %95 = vector.load %arg3[%c3_91, %c1_92, %c0_93, %c0_94] : memref<4x4x4x4xf32, #tpu.memory_space<vmem>>, vector<1x1x4x4xf32>
      %96 = vector.shape_cast %95 : vector<1x1x4x4xf32> to vector<4x4xf32>
      %cst_95 = arith.constant dense<0.000000e+00> : vector<16x4xf32>
      %97 = tpu.matmul %94, %96, %cst_95 {dimension_numbers = #tpu.dot_dimension_numbers<[1], [0], [0], [1], [0, 0, 1, 1], [], []>} : vector<16x4xf32>, vector<4x4xf32>, vector<16x4xf32> -> vector<16x4xf32>
      %98 = arith.addf %93, %97 : vector<16x4xf32>
      %99 = vector.extract_strided_slice %12 {offsets = [1, 0], sizes = [16, 4], strides = [1, 1]} : vector<18x4xf32> to vector<16x4xf32>
      %c3_96 = arith.constant 3 : index
      %c2_97 = arith.constant 2 : index
      %c0_98 = arith.constant 0 : index
      %c0_99 = arith.constant 0 : index
      %100 = vector.load %arg3[%c3_96, %c2_97, %c0_98, %c0_99] : memref<4x4x4x4xf32, #tpu.memory_space<vmem>>, vector<1x1x4x4xf32>
      %101 = vector.shape_cast %100 : vector<1x1x4x4xf32> to vector<4x4xf32>
      %cst_100 = arith.constant dense<0.000000e+00> : vector<16x4xf32>
      %102 = tpu.matmul %99, %101, %cst_100 {dimension_numbers = #tpu.dot_dimension_numbers<[1], [0], [0], [1], [0, 0, 1, 1], [], []>} : vector<16x4xf32>, vector<4x4xf32>, vector<16x4xf32> -> vector<16x4xf32>
      %103 = arith.addf %98, %102 : vector<16x4xf32>
      %104 = vector.extract_strided_slice %12 {offsets = [2, 0], sizes = [16, 4], strides = [1, 1]} : vector<18x4xf32> to vector<16x4xf32>
      %c3_101 = arith.constant 3 : index
      %c3_102 = arith.constant 3 : index
      %c0_103 = arith.constant 0 : index
      %c0_104 = arith.constant 0 : index
      %105 = vector.load %arg3[%c3_101, %c3_102, %c0_103, %c0_104] : memref<4x4x4x4xf32, #tpu.memory_space<vmem>>, vector<1x1x4x4xf32>
      %106 = vector.shape_cast %105 : vector<1x1x4x4xf32> to vector<4x4xf32>
      %cst_105 = arith.constant dense<0.000000e+00> : vector<16x4xf32>
      %107 = tpu.matmul %104, %106, %cst_105 {dimension_numbers = #tpu.dot_dimension_numbers<[1], [0], [0], [1], [0, 0, 1, 1], [], []>} : vector<16x4xf32>, vector<4x4xf32>, vector<16x4xf32> -> vector<16x4xf32>
      %108 = arith.addf %103, %107 : vector<16x4xf32>
      %c0_106 = arith.constant 0 : index
      %c0_107 = arith.constant 0 : index
      %c3_108 = arith.constant 3 : index
      %109 = arith.index_cast %arg6 : i32 to index
      %c0_109 = arith.constant 0 : index
      %c0_110 = arith.constant 0 : index
      %110 = vector.load %arg5[%c0_106, %c0_107, %c3_108, %109, %c0_109, %c0_110] : memref<1x1x4x8x16x4xf32, #tpu.memory_space<vmem>>, vector<1x1x1x1x16x4xf32>
      %111 = vector.shape_cast %110 : vector<1x1x1x1x16x4xf32> to vector<16x4xf32>
      %112 = vector.shape_cast %108 : vector<16x4xf32> to vector<1x1x1x1x16x4xf32>
      tpu.vector_store %arg5[%c0_106, %c0_107, %c3_108, %109, %c0_109, %c0_110], %112 {strides = array<i32>} : memref<1x1x4x8x16x4xf32, #tpu.memory_space<vmem>>, vector<1x1x1x1x16x4xf32>,
    }
    %c8_i32_1 = arith.constant 8 : i32
    return
  }
  func.func @transform_0(%arg0: i32, %arg1: i32) -> (i32, i32, i32, i32, i32) {
    %c0_i32 = arith.constant 0 : i32
    %c0_i32_0 = arith.constant 0 : i32
    %c0_i32_1 = arith.constant 0 : i32
    %c0_i32_2 = arith.constant 0 : i32
    return %arg0, %arg1, %c0_i32, %c0_i32_0, %c0_i32_1 : i32, i32, i32, i32, i32
  }
  func.func @transform_1(%arg0: i32, %arg1: i32) -> (i32, i32, i32, i32) {
    %c0_i32 = arith.constant 0 : i32
    %c0_i32_0 = arith.constant 0 : i32
    %c0_i32_1 = arith.constant 0 : i32
    %c0_i32_2 = arith.constant 0 : i32
    %c0_i32_3 = arith.constant 0 : i32
    return %c0_i32, %c0_i32_0, %c0_i32_1, %c0_i32_2 : i32, i32, i32, i32
  }
  func.func @transform_2(%arg0: i32, %arg1: i32) -> (i32, i32) {
    %c0_i32 = arith.constant 0 : i32
    %c0_i32_0 = arith.constant 0 : i32
    %c0_i32_1 = arith.constant 0 : i32
    return %c0_i32, %c0_i32_0 : i32, i32
  }
  func.func @transform_3(%arg0: i32, %arg1: i32) -> (i32, i32, i32, i32, i32, i32) {
    %c0_i32 = arith.constant 0 : i32
    %c0_i32_0 = arith.constant 0 : i32
    %c0_i32_1 = arith.constant 0 : i32
    %c0_i32_2 = arith.constant 0 : i32
    %c0_i32_3 = arith.constant 0 : i32
    return %arg0, %arg1, %c0_i32, %c0_i32_0, %c0_i32_1, %c0_i32_2 : i32, i32, i32, i32, i32, i32
  }
}

</mosaic_0001>

<bundles_post_ra>
// kernel: upsample_forward.1
= control target key start
LH: loop header
LB: loop body
LE: loop exit
PB: predicated region body
PF: predicated region fallthrough
CT: control target
= control target key end

     0   :  { %s2131_s12 = smov 0   ;;  %s2133_s13 = smov 0   ;;  %s2354_s0 = inlined_call_operand.vmem [shape: f32[2,2,10,18,4], index: 0, kind: input, shape index: {}]   ;;  %s2355_s1 = inlined_call_operand.vmem [shape: f32[4,4,4,4], index: 1, kind: input, shape index: {}]   ;;  %s2356_s2 = inlined_call_operand.vmem [shape: f32[1,4], index: 2, kind: input, shape index: {}]   ;;  %s2357_s3 = inlined_call_operand.vmem [shape: f32[2,2,4,8,16,4], index: 3, kind: output, shape index: {}]  }
   0x1   :  { %s2135_s14 = smov 0   ;;  %s2137_s15 = smov 0  }
   0x2   :  { %s2139_s16 = smov 0  }
   0x3 LB: > { %s22_s17 = sadd.s32 1, %s2097_s14  ;;  %s25_s18 = sadd.s32 1, %s2101_s15  ;;  %s2105_s16 = sphi %s2139_s16, %s13_s16   ;;  %s2101_s15 = sphi %s2137_s15, %s2361_s15   ;;  %s2097_s14 = sphi %s2135_s14, %s2360_s14   ;;  %s2093_s13 = sphi %s2133_s13, %s2359_s13   ;;  %s2089_s12 = sphi %s2131_s12, %s2358_s12  }
   0x4   : > { %p23_p0 = scmp.ge.s32.totalorder %s22_s17, 2  ;;  %p1766_p1 = scmp.ge.s32.totalorder %s2105_s16, 1 }
   0x5   : > { %p157_p2 = scmp.lt.s32.totalorder %s2105_s16, 5 }
   0x6   : > { %s2363_s17 = smov (%p23_p0, %s22_s17), 0  ;;  %s2365_s18 = smov (!%p23_p0, %s25_s18), %s2101_s15 }
   0x7   : > { %p158_p3 = pnand %p1766_p1, %p157_p2  ;;  %p27_p4 = scmp.ge.s32.totalorder %s2365_s18, 2 }
   0x8   : > { %p189_p5 = scmp.lt.s32.totalorder (!%p158_p3), %s2093_s13, 1  ;;  %p191_p6 = scmp.lt.s32.totalorder (!%p158_p3), %s2089_s12, 1  ;;  %v2164_v0 = vld [vmem:[%s2356_s2] ss:$0 sm:$0xff] (!%p158_p3) }
   0x9   : > { %s2367_s18 = smov (%p27_p4, %s2365_s18), 0  ;;  %161 = sbr.rel (%p158_p3) target bundleno = 299 (0x12b), region = 32 }
   0xa   : > { %s2176_s8 = smov (!%p158_p3), 0  }
  0x10   : > { %s2369_s13 = smov (!%p189_p5, %s2093_s13), 1  ;;  %s2371_s12 = smov (!%p191_p6, %s2089_s12), 1 }
  0x11   : > { %s2014_s21 = smul.u32 60, %s2369_s13  ;;  %s1769_s22 = sshll.u32 %s2369_s13, 7 }
  0x12   : > { %s2013_s23 = smul.u32 30, %s2371_s12  ;;  %s1768_s24 = sshll.u32 %s2371_s12, 6 }
  0x13   : > { %s204_s25 = sadd.s32 %s1769_s22, %s1768_s24 }
  0x14   : > { %s195_s26 = sadd.s32 %s2014_s21, %s2013_s23  ;;  %s1770_s27 = sshll.u32 %s204_s25, 3 }
  0x15   : > { %s1767_s28 = sshll.u32 %s195_s26, 3  ;;  %s2169_s4 = scalar_lea.vmem %s2357_s3, %s1770_s27 }
  0x16   : > { %s2174_s7 = scalar_lea.vmem %s2354_s0, %s1767_s28 }
  0x17 LB: >> { %v231_v1 = vld [vmem:[%s2355_s1] sm:$0xf]  ;;  %vm239_vm0 = vcmask 1043456   ;;  %v1794_v2 = vld [vmem:[%s2355_s1 + $0x10] sm:$0xf]  ;;  %s214_s22 = smul.u32 24, %s2109_s8  ;;  %s2109_s8 = sphi %s2176_s8, %s213_s8  }
  0x18   : >> { %1901 = vmatprep.subr.msk.mxu0 %vm239_vm0, %v231_v1  ;;  %1921 = vmatprep.subr.msk.mxu1 %vm239_vm0, %v1794_v2  ;;  %v1781_v3 = vld [vmem:[%s2355_s1 + $0x4] sm:$0xf]  ;;  %v1798_v4 = vld [vmem:[%s2355_s1 + $0x14] sm:$0xf]  ;;  %vm232_vm1 = vcmask 31744   ;;  %vm329_vm2 = vcmask 1046528  }
  0x19   : >> { %1902 = vmatpush3.msk.msra.mxu0 %vm239_vm0, %v231_v1  ;;  %1922 = vmatpush3.msk.msra.mxu1 %vm239_vm0, %v1794_v2  ;;  %s2201_s23 = scalar_lea.vmem %s2174_s7, %s214_s22  ;;  %vm687_vm3 = vcmask 1045504   ;;  %v1785_v13 = vld [vmem:[%s2355_s1 + $0x8] sm:$0xf]  ;;  %v1802_v17 = vld [vmem:[%s2355_s1 + $0x18] sm:$0xf] }
  0x1a   : >> { %1906 = vmatprep.subr.msk.mxu0 %vm239_vm0, %v1781_v3  ;;  %1926 = vmatprep.subr.msk.mxu1 %vm239_vm0, %v1798_v4  ;;  %v216_v5 = vld [vmem:[%s2201_s23] sm:$0xff]  ;;  %v217_v6 = vld [vmem:[%s2201_s23 + $0x8] sm:$0xff]  ;;  %v218_v7 = vld [vmem:[%s2201_s23 + $0x10] sm:$0x3] }
  0x1b   : >> { %1903 = vmatprep.mubr.msk.f32.mxu0 %vm232_vm1, %v216_v5  ;;  %v330_v8 = vrot.slane %v216_v5, 1  ;;  %v688_v9 = vrot.slane %v216_v5, 2  ;;  %v689_v10 = vrot.slane %v217_v6, 2  ;;  %v331_v11 = vrot.slane %v217_v6, 1  ;;  %v1771_v18 = vld [vmem:[%s2201_s23 + $0x18] sm:$0xff]  ;;  %v1772_v19 = vld [vmem:[%s2201_s23 + $0x20] sm:$0xff] }
  0x1c   : >> { %1904 = vmatmul.mubr.msk.f32.vlgmr.msra.gmra.mrb[0].mxu0 %vm232_vm1, %v217_v6  ;;  %v333_v12 = vrot.slane %v218_v7, 1  ;;  %v691_v20 = vrot.slane %v218_v7, 2  ;;  %v510_v21 = vrot.slane %v1771_v18, 1  ;;  %v511_v22 = vrot.slane %v1772_v19, 1  ;;  %v1789_v23 = vld [vmem:[%s2355_s1 + $0xc] sm:$0xf] }
  0x1d   : >> { %v332_v14 = vsel %vm329_vm2, %v330_v8, %v331_v11  ;;  %1907 = vmatpush3.msk.msra.mxu0 %vm239_vm0, %v1781_v3  ;;  %v690_v15 = vsel %vm687_vm3, %v688_v9, %v689_v10  ;;  %v1773_v26 = vld [vmem:[%s2201_s23 + $0x28] sm:$0x3]  ;;  %v1806_v27 = vld [vmem:[%s2355_s1 + $0x1c] sm:$0xf]  ;;  %v861_v29 = vrot.slane %v1771_v18, 2  ;;  %v862_v30 = vrot.slane %v1772_v19, 2 }
  0x1e   : >> { %1923 = vmatprep.mubr.msk.f32.mxu1 %vm232_vm1, %v332_v14  ;;  %v334_v16 = vsel %vm329_vm2, %v331_v11, %v333_v12  ;;  %1908 = vmatprep.mubr.msk.f32.mxu0 %vm232_vm1, %v332_v14  ;;  %v692_v24 = vsel %vm687_vm3, %v689_v10, %v691_v20  ;;  %v512_v25 = vsel %vm329_vm2, %v510_v21, %v511_v22  ;;  %v513_v28 = vrot.slane %v1773_v26, 1  ;;  %v1813_v31 = vld [vmem:[%s2355_s1 + $0x20] sm:$0xf]  ;;  %v1832_v34 = vld [vmem:[%s2355_s1 + $0x30] sm:$0xf]  ;;  %v1775_v42 = vld [vmem:[%s2201_s23 + $0x38] sm:$0xff] }
  0x1f   : >> { %1924 = vmatmul.mubr.msk.f32.vlgmr.msra.gmra.mrb[0].mxu1 %vm232_vm1, %v334_v16  ;;  %1911 = vmatprep.subr.msk.mxu0 %vm239_vm0, %v1785_v13  ;;  %v863_v33 = vsel %vm687_vm3, %v861_v29, %v862_v30  ;;  %v864_v35 = vrot.slane %v1773_v26, 2  ;;  %v1817_v36 = vld [vmem:[%s2355_s1 + $0x24] sm:$0xf]  ;;  %v1836_v38 = vld [vmem:[%s2355_s1 + $0x34] sm:$0xf]  ;;  %v1210_v44 = vrot.slane %v1775_v42, 1 }
  0x20   : >> { %1927 = vmatpush3.msk.msra.mxu1 %vm239_vm0, %v1798_v4  ;;  %1928 = vmatprep.mubr.msk.f32.mxu1 %vm232_vm1, %v690_v15  ;;  %v514_v32 = vsel %vm329_vm2, %v511_v22, %v513_v28  ;;  %v1821_v39 = vld [vmem:[%s2355_s1 + $0x28] sm:$0xf]  ;;  %v1840_v40 = vld [vmem:[%s2355_s1 + $0x38] sm:$0xf]  ;;  %v1774_v41 = vld [vmem:[%s2201_s23 + $0x30] sm:$0xff]  ;;  %v1551_v51 = vrot.slane %v1775_v42, 2 }
  0x21   : >> { %1931 = vmatprep.subr.msk.mxu1 %vm239_vm0, %v1802_v17  ;;  %v865_v37 = vsel %vm687_vm3, %v862_v30, %v864_v35  ;;  %v1209_v43 = vrot.slane %v1774_v41, 1  ;;  %v1825_v45 = vld [vmem:[%s2355_s1 + $0x2c] sm:$0xf]  ;;  %v1776_v47 = vld [vmem:[%s2201_s23 + $0x40] sm:$0x3]  ;;  %v1550_v50 = vrot.slane %v1774_v41, 2 }
  0x22   : >> { %v1844_v48 = vld [vmem:[%s2355_s1 + $0x3c] sm:$0xf]  ;;  %v1212_v49 = vrot.slane %v1776_v47, 1  ;;  %v1553_v54 = vrot.slane %v1776_v47, 2  ;;  %s1793_s23 = sshll.u32 %s2109_s8, 4  ;;  %s213_s8 = sadd.s32 1, %s2109_s8  }
  0x23   : >> { %v1211_v46 = vsel %vm329_vm2, %v1209_v43, %v1210_v44  ;;  %v1552_v53 = vsel %vm687_vm3, %v1550_v50, %v1551_v51  ;;  %s600_s30 = scalar_lea.vmem %s2169_s4, %s1793_s23  ;;  %p210_p7 = scmp.ge.s32.totalorder %s213_s8, 8  }
  0x24   : >> { %1909 = vmatmul.mubr.msk.f32.vlgmr.msra.gmra.mrb[0].mxu0 %vm232_vm1, %v334_v16  ;;  %v1213_v52 = vsel %vm329_vm2, %v1210_v44, %v1212_v49  ;;  %v1554_v55 = vsel %vm687_vm3, %v1551_v51, %v1553_v54 }
  0x25   : >> { %1912 = vmatpush3.msk.msra.mxu0 %vm239_vm0, %v1785_v13  ;;  %1913 = vmatprep.mubr.msk.f32.mxu0 %vm232_vm1, %v1771_v18 }
  0x26   : >> { %1916 = vmatprep.subr.msk.mxu0 %vm239_vm0, %v1789_v23 }
  0x27   : >> { %1929 = vmatmul.mubr.msk.f32.vlgmr.msra.gmra.mrb[0].mxu1 %vm232_vm1, %v692_v24 }
  0x28   : >> { %1932 = vmatpush3.msk.msra.mxu1 %vm239_vm0, %v1802_v17  ;;  %1933 = vmatprep.mubr.msk.f32.mxu1 %vm232_vm1, %v512_v25 }
  0x29   : >> { %1936 = vmatprep.subr.msk.mxu1 %vm239_vm0, %v1806_v27 }
  0x2c   : >> { %1914 = vmatmul.mubr.msk.f32.vlgmr.msra.gmra.mrb[0].mxu0 %vm232_vm1, %v1772_v19 }
  0x2d   : >> { %1917 = vmatpush3.msk.msra.mxu0 %vm239_vm0, %v1789_v23  ;;  %1918 = vmatprep.mubr.msk.f32.mxu0 %vm232_vm1, %v512_v25 }
  0x2e   : >> { %1941 = vmatprep.subr.msk.mxu0 %vm239_vm0, %v1813_v31 }
  0x2f   : >> { %1934 = vmatmul.mubr.msk.f32.vlgmr.msra.gmra.mrb[0].mxu1 %vm232_vm1, %v514_v32 }
  0x30   : >> { %1937 = vmatpush3.msk.msra.mxu1 %vm239_vm0, %v1806_v27  ;;  %1938 = vmatprep.mubr.msk.f32.mxu1 %vm232_vm1, %v863_v33 }
  0x31   : >> { %1961 = vmatprep.subr.msk.mxu1 %vm239_vm0, %v1832_v34 }
  0x34   : >> { %1919 = vmatmul.mubr.msk.f32.vlgmr.msra.gmra.mrb[0].mxu0 %vm232_vm1, %v514_v32 }
  0x35   : >> { %1942 = vmatpush3.msk.msra.mxu0 %vm239_vm0, %v1813_v31  ;;  %1943 = vmatprep.mubr.msk.f32.mxu0 %vm232_vm1, %v1771_v18 }
  0x36   : >> { %1946 = vmatprep.subr.msk.mxu0 %vm239_vm0, %v1817_v36 }
  0x37   : >> { %1939 = vmatmul.mubr.msk.f32.vlgmr.msra.gmra.mrb[0].mxu1 %vm232_vm1, %v865_v37 }
  0x38   : >> { %1962 = vmatpush3.msk.msra.mxu1 %vm239_vm0, %v1832_v34  ;;  %1944 = vmatmul.mubr.msk.f32.vlgmr.msra.gmra.mrb[2].mxu0 %vm232_vm1, %v1772_v19 }
  0x39   : >> { %1963 = vmatprep.mubr.msk.f32.mxu1 %vm232_vm1, %v512_v25  ;;  %1966 = vmatprep.subr.msk.mxu1 %vm239_vm0, %v1836_v38 }
  0x3a   : >> { %1947 = vmatpush3.msk.msra.mxu0 %vm239_vm0, %v1817_v36  ;;  %1948 = vmatprep.mubr.msk.f32.mxu0 %vm232_vm1, %v512_v25 }
  0x3b   : >> { %1964 = vmatmul.mubr.msk.f32.vlgmr.msra.gmra.mrb[2].mxu1 %vm232_vm1, %v514_v32  ;;  %1951 = vmatprep.subr.msk.mxu0 %vm239_vm0, %v1821_v39 }
  0x3c   : >> { %1967 = vmatpush3.msk.msra.mxu1 %vm239_vm0, %v1836_v38  ;;  %1968 = vmatprep.mubr.msk.f32.mxu1 %vm232_vm1, %v863_v33 }
  0x3d   : >> { %1971 = vmatprep.subr.msk.mxu1 %vm239_vm0, %v1840_v40 }
  0x40   : >> { %1949 = vmatmul.mubr.msk.f32.vlgmr.msra.gmra.mrb[2].mxu0 %vm232_vm1, %v514_v32 }
  0x41   : >> { %1952 = vmatpush3.msk.msra.mxu0 %vm239_vm0, %v1821_v39  ;;  %1953 = vmatprep.mubr.msk.f32.mxu0 %vm232_vm1, %v1774_v41 }
  0x42   : >> { %1956 = vmatprep.subr.msk.mxu0 %vm239_vm0, %v1825_v45 }
  0x43   : >> { %1969 = vmatmul.mubr.msk.f32.vlgmr.msra.gmra.mrb[2].mxu1 %vm232_vm1, %v865_v37 }
  0x44   : >> { %1972 = vmatpush3.msk.msra.mxu1 %vm239_vm0, %v1840_v40  ;;  %1973 = vmatprep.mubr.msk.f32.mxu1 %vm232_vm1, %v1211_v46 }
  0x45   : >> { %1976 = vmatprep.subr.msk.mxu1 %vm239_vm0, %v1844_v48 }
  0x48   : >> { %1954 = vmatmul.mubr.msk.f32.vlgmr.msra.gmra.mrb[2].mxu0 %vm232_vm1, %v1775_v42 }
  0x49   : >> { %1957 = vmatpush3.msk.msra.mxu0 %vm239_vm0, %v1825_v45  ;;  %1958 = vmatprep.mubr.msk.f32.mxu0 %vm232_vm1, %v1211_v46 }
  0x4b   : >> { %1974 = vmatmul.mubr.msk.f32.vlgmr.msra.gmra.mrb[2].mxu1 %vm232_vm1, %v1213_v52 }
  0x4c   : >> { %1977 = vmatpush3.msk.msra.mxu1 %vm239_vm0, %v1844_v48  ;;  %1978 = vmatprep.mubr.msk.f32.mxu1 %vm232_vm1, %v1552_v53 }
  0x50   : >> { %1959 = vmatmul.mubr.msk.f32.vlgmr.msra.gmra.mrb[2].mxu0 %vm232_vm1, %v1213_v52 }
  0x53   : >> { %1979 = vmatmul.mubr.msk.f32.vlgmr.msra.gmra.mrb[2].mxu1 %vm232_vm1, %v1554_v55 }
 0x107   : >> { %v1920_v56 = vpop.f32.mrb[0].mxu0 }
 0x108   : >> { %v1981_v57 = vadd.f32 %v1920_v56, %v2164_v0  ;;  %v588_v58 = vpop.f32.mrb[1].mxu0 }
 0x109   : >> { %v1982_v59 = vadd.f32 %v2164_v0, %v588_v58 }
 0x10a   : >> { %602 = vst.msk [vmem:[%s600_s30 + $0x8] sm:$0xff] %vm232_vm1, %v1981_v57  ;;  %v1940_v60 = vpop.f32.mrb[0].mxu1 }
 0x10b   : >> { %601 = vst.msk [vmem:[%s600_s30] sm:$0xff] %vm232_vm1, %v1982_v59  ;;  %v1983_v61 = vadd.f32 %v1940_v60, %v2164_v0  ;;  %v939_v62 = vpop.f32.mrb[1].mxu1 }
 0x10c   : >> { %v1984_v63 = vadd.f32 %v2164_v0, %v939_v62 }
 0x10d   : >> { %1812 = vst.msk [vmem:[%s600_s30 + $0x88] sm:$0xff] %vm232_vm1, %v1983_v61 }
 0x10e   : >> { %1811 = vst.msk [vmem:[%s600_s30 + $0x80] sm:$0xff] %vm232_vm1, %v1984_v63 }
 0x123   : >> { %v1960_v1 = vpop.f32.mrb[2].mxu0 }
 0x124   : >> { %v1985_v2 = vadd.f32 %v1960_v1, %v2164_v0  ;;  %v1287_v3 = vpop.f32.mrb[3].mxu0  ;;  %212 = sbr.rel (!%p210_p7) target bundleno = 23 (0x17), region = 91 }
 0x125   : >> { %v1986_v4 = vadd.f32 %v2164_v0, %v1287_v3 }
 0x126   : >> { %1831 = vst.msk [vmem:[%s600_s30 + $0x108] sm:$0xff] %vm232_vm1, %v1985_v2  ;;  %v1980_v5 = vpop.f32.mrb[2].mxu1 }
 0x127   : >> { %1830 = vst.msk [vmem:[%s600_s30 + $0x100] sm:$0xff] %vm232_vm1, %v1986_v4  ;;  %v1987_v6 = vadd.f32 %v1980_v5, %v2164_v0  ;;  %v1628_v7 = vpop.f32.mrb[3].mxu1 }
 0x128   : >> { %v1988_v8 = vadd.f32 %v2164_v0, %v1628_v7 }
 0x129   : >> { %1850 = vst.msk [vmem:[%s600_s30 + $0x188] sm:$0xff] %vm232_vm1, %v1987_v6 }
 0x12a   : >> { %1849 = vst.msk [vmem:[%s600_s30 + $0x180] sm:$0xff] %vm232_vm1, %v1988_v8 }
 0x12b PF: > { %s13_s16 = sadd.s32 1, %s2105_s16   ;;  %s2358_s12 = smov %s2097_s14 }
 0x12c   : > { %p10_p8 = scmp.ge.s32.totalorder %s13_s16, 6   ;;  %s2359_s13 = smov %s2101_s15 }
 0x12d   : > { %s2360_s14 = smov %s2363_s17  ;;  %s2361_s15 = smov %s2367_s18 }
 0x12e   :  { %12 = sbr.rel (!%p10_p8) target bundleno = 3 (0x3), region = 102 }

</bundles_post_ra>
